<compile_context>
chip_gen: v7x
topology: tpu7x:2x2x1
jax: 0.10.0
libtpu: 0.0.40
codegen_flags: <defaults>
</compile_context>

<pallas_src>
import jax
import jax.numpy as jnp
from jax.experimental import pallas as pl
from jax.experimental.pallas import tpu as pltpu


def _round_up(x, m):
    return (x + m - 1) // m * m


def _pick_tile(dim, pref, align):
    """Largest usable block size <= pref for a dimension of size `dim`.

    Full-extent block for small dims (always legal), otherwise the largest
    multiple of `align` that divides `dim` exactly (no padding, no ragged
    blocks), otherwise `pref` (ragged last block; Pallas masks OOB writes)."""
    if dim <= pref:
        return dim
    for t in range(pref, align - 1, -align):
        if dim % t == 0:
            return t
    return pref


def _wn_matmul_kernel(scale_ref, x_ref, v_ref, b_ref, o_ref, acc_ref):
    # scale_ref: SMEM (1,) f32 = g / ||v||_F
    # x_ref: (tm, tk), v_ref: (tn, tk), b_ref: (1, tn) f32, o_ref: (tm, tn)
    k = pl.program_id(2)

    @pl.when(k == 0)
    def _():
        acc_ref[...] = jnp.zeros_like(acc_ref)

    # Contract the last dim of BOTH operands (x @ v.T): no materialized
    # transpose of the weight, native-dtype operands, f32 MXU accumulation.
    acc_ref[...] += jax.lax.dot_general(
        x_ref[...], v_ref[...],
        dimension_numbers=(((1,), (1,)), ((), ())),
        preferred_element_type=jnp.float32)

    @pl.when(k == pl.num_programs(2) - 1)
    def _():
        y = acc_ref[...] * scale_ref[0] + b_ref[...]
        o_ref[...] = y.astype(o_ref.dtype)


def weightnorm_linear(x, v, g, b, *, tm_pref=512, tn_pref=512, tk_pref=1024):
    """WeightNorm(Linear) forward: y = x @ (v * g/||v||_F).T + b.

    x: [B, IN], v: [OUT, IN] (PyTorch Linear weight layout), g: [1] or scalar,
    b: [OUT].
    """
    B, IN = x.shape
    OUT, IN2 = v.shape
    assert IN == IN2, "x / v inner-dimension mismatch"

    # scale = g / ||v||_F on the ORIGINAL (unpadded) weight. XLA's reduce is
    # already at the HBM roofline; no dedicated Pallas norm sweep needed.
    ss = jnp.sum(jnp.square(v.astype(jnp.float32)))
    scale = (jnp.reshape(g, ()).astype(jnp.float32) * jax.lax.rsqrt(ss)).reshape(1)

    # Tile selection: prefer big tiles, never pad M/N, keep K exact.
    tm = _pick_tile(B, tm_pref, 8)      # second-to-last dims need 8-multiples
    tn = _pick_tile(OUT, tn_pref, 128)  # lane (last) dims need 128-multiples
    tk = _pick_tile(IN, tk_pref, 128)

    # v7x megacore guard: ensure >= 2 parallel (M,N) output tiles when possible
    # so both TensorCores get work (harmless no-op on 1-TC v5e/v6e).
    if pl.cdiv(B, tm) * pl.cdiv(OUT, tn) < 2:
        if OUT > 128:
            tn = max(128, _round_up(pl.cdiv(OUT, 2), 128))
        elif B > 8:
            tm = max(8, _round_up(pl.cdiv(B, 2), 8))

    # Only the contraction axis must be zero-padded (it is summed over);
    # ragged M/N edge blocks are masked by Pallas and sliced off naturally.
    if IN % tk != 0:
        Kp = _round_up(IN, tk)
        x = jnp.pad(x, ((0, 0), (0, Kp - IN)))
        v = jnp.pad(v, ((0, 0), (0, Kp - IN)))
        K = Kp
    else:
        K = IN

    b2 = b.astype(jnp.float32).reshape(1, OUT)

    grid = (pl.cdiv(B, tm), pl.cdiv(OUT, tn), K // tk)

    out = pl.pallas_call(
        _wn_matmul_kernel,
        out_shape=jax.ShapeDtypeStruct((B, OUT), x.dtype),
        grid_spec=pltpu.PrefetchScalarGridSpec(
            num_scalar_prefetch=0,
            grid=grid,
            in_specs=[
                pl.BlockSpec(memory_space=pltpu.MemorySpace.SMEM),       # scale
                pl.BlockSpec((tm, tk), lambda i, j, k: (i, k)),          # x
                pl.BlockSpec((tn, tk), lambda i, j, k: (j, k)),          # v
                pl.BlockSpec((1, tn), lambda i, j, k: (0, j)),           # bias
            ],
            out_specs=pl.BlockSpec((tm, tn), lambda i, j, k: (i, j)),
            scratch_shapes=[pltpu.VMEM((tm, tn), jnp.float32)],
        ),
        compiler_params=pltpu.CompilerParams(
            dimension_semantics=("parallel", "parallel", "arbitrary"),
            # Tiles above use ~7-13 MiB double-buffered; 48 MiB leaves plenty
            # of headroom even under v7x's 64 MiB physical VMEM.
            vmem_limit_bytes=48 * 1024 * 1024,
        ),
    )(scale, x, v, b2)
    return out


if __name__ == "__main__":
    key = jax.random.PRNGKey(0)
    keys = jax.random.split(key, 6)

    def reference(x, v, g, b):
        # Pure-JAX reference of the exact module semantics.
        w = v * (jnp.reshape(g, ()) / jnp.linalg.norm(v))
        return jnp.dot(x, w.T, precision=jax.lax.Precision.HIGHEST) + b[None, :]

    # --- Small, module-like shapes (single-block path) -----------------------
    B, IN, OUT = 8, 32, 32
    w0 = jax.random.normal(keys[0], (OUT, IN), dtype=jnp.float32) * 0.1
    b0 = jax.random.normal(keys[1], (OUT,), dtype=jnp.float32) * 0.1
    g0 = jnp.linalg.norm(w0).reshape(1)          # WeightNorm._reset(): g=||w||
    v0 = w0 / g0                                 #                      v=w/g
    x0 = jax.random.normal(keys[2], (B, IN), dtype=jnp.float32)

    y0 = jax.block_until_ready(weightnorm_linear(x0, v0, g0, b0))
    assert jnp.allclose(y0, reference(x0, v0, g0, b0), atol=1e-4, rtol=1e-4), \
        "small-shape mismatch vs reference"

    # --- Larger shape exercising the tiled (2,2,2) grid, no padding needed ---
    B, IN, OUT = 1024, 1280, 768
    w1 = jax.random.normal(keys[3], (OUT, IN), dtype=jnp.float32) * 0.05
    b1 = jax.random.normal(keys[4], (OUT,), dtype=jnp.float32) * 0.1
    g1 = jnp.linalg.norm(w1).reshape(1)
    v1 = w1 / g1
    x1 = jax.random.normal(keys[5], (B, IN), dtype=jnp.float32)

    y1 = jax.block_until_ready(weightnorm_linear(x1, v1, g1, b1))
    assert jnp.allclose(y1, reference(x1, v1, g1, b1), atol=2e-3, rtol=2e-3), \
        "tiled-shape mismatch vs reference"

    print("KERNEL_OK")
</pallas_src>

<mosaic_0001>
module attributes {stable_mosaic.version = 11 : i64} {
  func.func @_wn_matmul_kernel(%arg0: i32, %arg1: i32, %arg2: i32, %arg3: memref<1xf32, #tpu.memory_space<smem>>, %arg4: memref<8x32xf32, #tpu.memory_space<vmem>>, %arg5: memref<32x32xf32, #tpu.memory_space<vmem>>, %arg6: memref<1x32xf32, #tpu.memory_space<vmem>>, %arg7: memref<8x32xf32, #tpu.memory_space<vmem>>, %arg8: memref<8x32xf32, #tpu.memory_space<vmem>>) attributes {dimension_semantics = [#tpu.dimension_semantics<parallel>, #tpu.dimension_semantics<parallel>, #tpu.dimension_semantics<arbitrary>], iteration_bounds = array<i64: 1, 1, 1>, scalar_prefetch = 0 : i64, scratch_operands = 1 : i64, tpu.core_type = #tpu.core_type<tc>, window_params = [{transform_indices = @transform_0, window_bounds = array<i64: 1>}, {transform_indices = @transform_1, window_bounds = array<i64: 8, 32>}, {transform_indices = @transform_2, window_bounds = array<i64: 32, 32>}, {transform_indices = @transform_3, window_bounds = array<i64: 1, 32>}, {transform_indices = @transform_4, window_bounds = array<i64: 8, 32>}]} {
    %c0_i32 = arith.constant 0 : i32
    %0 = arith.cmpi eq, %arg2, %c0_i32 : i32
    %1 = arith.extui %0 : i1 to i32
    %c0_i32_0 = arith.constant 0 : i32
    %2 = arith.cmpi ne, %1, %c0_i32_0 : i32
    scf.if %2 {
      %cst_10 = arith.constant 0.000000e+00 : f32
      %12 = vector.broadcast %cst_10 : f32 to vector<8x32xf32>
      %c0_11 = arith.constant 0 : index
      %c0_12 = arith.constant 0 : index
      %13 = vector.load %arg8[%c0_11, %c0_12] : memref<8x32xf32, #tpu.memory_space<vmem>>, vector<8x32xf32>
      tpu.vector_store %arg8[%c0_11, %c0_12], %12 {strides = array<i32>} : memref<8x32xf32, #tpu.memory_space<vmem>>, vector<8x32xf32>,
    } else {
    }
    %c0 = arith.constant 0 : index
    %c0_1 = arith.constant 0 : index
    %3 = vector.load %arg8[%c0, %c0_1] : memref<8x32xf32, #tpu.memory_space<vmem>>, vector<8x32xf32>
    %c0_2 = arith.constant 0 : index
    %c0_3 = arith.constant 0 : index
    %4 = vector.load %arg4[%c0_2, %c0_3] : memref<8x32xf32, #tpu.memory_space<vmem>>, vector<8x32xf32>
    %c0_4 = arith.constant 0 : index
    %c0_5 = arith.constant 0 : index
    %5 = vector.load %arg5[%c0_4, %c0_5] : memref<32x32xf32, #tpu.memory_space<vmem>>, vector<32x32xf32>
    %cst = arith.constant dense<0.000000e+00> : vector<8x32xf32>
    %6 = tpu.matmul %4, %5, %cst {dimension_numbers = #tpu.dot_dimension_numbers<[1], [1], [0], [0], [0, 0, 1, 0], [], []>} : vector<8x32xf32>, vector<32x32xf32>, vector<8x32xf32> -> vector<8x32xf32>
    %7 = arith.addf %3, %6 : vector<8x32xf32>
    %c0_6 = arith.constant 0 : index
    %c0_7 = arith.constant 0 : index
    %8 = vector.load %arg8[%c0_6, %c0_7] : memref<8x32xf32, #tpu.memory_space<vmem>>, vector<8x32xf32>
    tpu.vector_store %arg8[%c0_6, %c0_7], %7 {strides = array<i32>} : memref<8x32xf32, #tpu.memory_space<vmem>>, vector<8x32xf32>,
    %c0_i32_8 = arith.constant 0 : i32
    %9 = arith.cmpi eq, %arg2, %c0_i32_8 : i32
    %10 = arith.extui %9 : i1 to i32
    %c0_i32_9 = arith.constant 0 : i32
    %11 = arith.cmpi ne, %10, %c0_i32_9 : i32
    scf.if %11 {
      %c0_10 = arith.constant 0 : index
      %c0_11 = arith.constant 0 : index
      %12 = vector.load %arg8[%c0_10, %c0_11] : memref<8x32xf32, #tpu.memory_space<vmem>>, vector<8x32xf32>
      %c0_12 = arith.constant 0 : index
      %13 = memref.load %arg3[%c0_12] : memref<1xf32, #tpu.memory_space<smem>>
      %14 = vector.broadcast %13 : f32 to vector<8x32xf32>
      %15 = arith.mulf %12, %14 : vector<8x32xf32>
      %c0_13 = arith.constant 0 : index
      %c0_14 = arith.constant 0 : index
      %16 = vector.load %arg6[%c0_13, %c0_14] : memref<1x32xf32, #tpu.memory_space<vmem>>, vector<1x32xf32>
      %17 = vector.broadcast %16 : vector<1x32xf32> to vector<8x32xf32>
      %18 = arith.addf %15, %17 : vector<8x32xf32>
      %c0_15 = arith.constant 0 : index
      %c0_16 = arith.constant 0 : index
      %19 = vector.load %arg7[%c0_15, %c0_16] : memref<8x32xf32, #tpu.memory_space<vmem>>, vector<8x32xf32>
      tpu.vector_store %arg7[%c0_15, %c0_16], %18 {strides = array<i32>} : memref<8x32xf32, #tpu.memory_space<vmem>>, vector<8x32xf32>,
    } else {
    }
    return
  }
  func.func @transform_0(%arg0: i32, %arg1: i32, %arg2: i32) -> i32 {
    %c0_i32 = arith.constant 0 : i32
    %c0_i32_0 = arith.constant 0 : i32
    return %c0_i32 : i32
  }
  func.func @transform_1(%arg0: i32, %arg1: i32, %arg2: i32) -> (i32, i32) {
    %c0_i32 = arith.constant 0 : i32
    return %arg0, %arg2 : i32, i32
  }
  func.func @transform_2(%arg0: i32, %arg1: i32, %arg2: i32) -> (i32, i32) {
    %c0_i32 = arith.constant 0 : i32
    return %arg1, %arg2 : i32, i32
  }
  func.func @transform_3(%arg0: i32, %arg1: i32, %arg2: i32) -> (i32, i32) {
    %c0_i32 = arith.constant 0 : i32
    %c0_i32_0 = arith.constant 0 : i32
    return %c0_i32, %arg1 : i32, i32
  }
  func.func @transform_4(%arg0: i32, %arg1: i32, %arg2: i32) -> (i32, i32) {
    %c0_i32 = arith.constant 0 : i32
    return %arg0, %arg1 : i32, i32
  }
}

</mosaic_0001>

<bundles_post_ra>
// kernel: tpu_custom_call.1
= control target key start
LH: loop header
LB: loop body
LE: loop exit
PB: predicated region body
PF: predicated region fallthrough
CT: control target
= control target key end

     0   :  { %10 = vsyncpa [#allocation5], 0  ;;  %s375_s0 = inlined_call_operand.<no memory space> [shape: f32[1], index: 0, kind: input, shape index: {}]   ;;  %s376_s1 = inlined_call_operand.hbm [shape: f32[8,32], index: 1, kind: input, shape index: {}]   ;;  %s377_s2 = inlined_call_operand.hbm [shape: f32[32,32], index: 2, kind: input, shape index: {}]   ;;  %s378_s3 = inlined_call_operand.vmem [shape: f32[1,32], index: 3, kind: input, shape index: {}]   ;;  %s379_s4 = inlined_call_operand.hbm [shape: f32[8,32], index: 4, kind: output, shape index: {}]  }
   0x1   :  { %11 = vsyncpa [#allocation8], 0 }
   0x2   :  { %12 = vsyncpa [#allocation6], 0  ;;  %s287_s15 = smov [#allocation4]   ;;  %s288_s17 = smov [#allocation7]  }
   0x3   :  { %s21_s16 = sshll.u32 %s287_s15, 4  ;;  %s30_s18 = sshll.u32 %s288_s17, 4  ;;  %s22_s16 = int_to_ptr.vmem [resolvable:$true] %s21_s16  ;;  %s320_s18 = int_to_ptr.vmem [resolvable:$true] %s30_s18 }
   0x4   :  { %s215_s21 = scalar_lea.hbm %s376_s1, 128 }
   0x5   :  { %p216_p0 = scmp.ne.s32.totalorder %s376_s1, %s215_s21  ;;  %p219_p1 = scmp.lt.u32.totalorder %s215_s21, %s376_s1 }
   0x7   :  { %p221_p2 = pnand %p219_p1, %p216_p0 }
   0x9   :  { %224 = shalt.err (!%p221_p2)
}
   0xa   :  { %s225_s26 = scalar_lea.vmem %s22_s16, 128  ;;  %p230_p4 = scmp.lt.s32.totalorder %s22_s16, %s22_s16 }
   0xb   :  { %p226_p3 = scmp.ne.s32.totalorder %s22_s16, %s225_s26  ;;  %p231_p5 = scmp.lt.s32.totalorder %s225_s26, %s225_s26 }
   0xd   :  { %p232_p6 = por %p231_p5, %p230_p4 }
   0xf   :  { %p233_p7 = pnand %p232_p6, %p226_p3 }
  0x11   :  { %236 = shalt.err (!%p233_p7)
}
  0x12   :  { %24 = dma.hbm_to_vmem [thread:$0]  %s376_s1, 128, %s22_s16, [#allocation5]  }
  0x13   :  { %s237_s5 = scalar_lea.hbm %s377_s2, 512 }
  0x14   :  { %p238_p8 = scmp.ne.s32.totalorder %s377_s2, %s237_s5  ;;  %p241_p9 = scmp.lt.u32.totalorder %s237_s5, %s377_s2 }
  0x16   :  { %p243_p10 = pnand %p241_p9, %p238_p8 }
  0x18   :  { %246 = shalt.err (!%p243_p10)
}
  0x19   :  { %s247_s10 = scalar_lea.vmem %s320_s18, 512  ;;  %p252_p12 = scmp.lt.s32.totalorder %s320_s18, %s320_s18 }
  0x1a   :  { %p248_p11 = scmp.ne.s32.totalorder %s320_s18, %s247_s10  ;;  %p253_p13 = scmp.lt.s32.totalorder %s247_s10, %s247_s10 }
  0x1c   :  { %p254_p0 = por %p253_p13, %p252_p12 }
  0x1e   :  { %p255_p1 = pnand %p254_p0, %p248_p11 }
  0x20   :  { %258 = shalt.err (!%p255_p1)
}
  0x21   :  { %s289_s1 = smov 128   ;;  %s290_s11 = smov 8  }
  0x22   :  { %36 = dma.hbm_to_vmem [thread:$0]  %s377_s2, 512, %s320_s18, [#allocation8], %s289_s1, %s289_s1, %s290_s11  }
  0x23   :  { %281 = dma.done.wait [#allocation5], 128  }
  0x24   :  { %282 = vsyncadd [#allocation5], 4294967168 }
  0x25   :  { %283 = dma.done.wait [#allocation8], 512  }
  0x26   :  { %284 = vsyncadd [#allocation8], 4294966784  ;;  %vm49_vm0 = vcmask 261120   ;;  %v291_v0 = vmov 0.0|0.0   ;;  %v292_v1 = vmov 0.0   ;;  %vm293_vm1 = vmmov 0  }
  0x27   :  { %199 = vmatprep.subr.bf16.mxu0 %v291_v0  ;;  %50 = vst.msk [vmem:[#allocation2] sm:$0xff] %vm49_vm0, %v292_v1  ;;  %196 = vmatprep.mubr.msk.f32.mxu0 %vm293_vm1, %v292_v1  ;;  %v53_v2 = vld [vmem:[#allocation7] sm:$0xff]  ;;  %v54_v3 = vld [vmem:[#allocation7 + $0x8] sm:$0xff]  ;;  %vm201_vm2 = vmpackc.low %vm49_vm0, %vm49_vm0  ;;  %v150_v13 = vstv %s375_s0  ;;  %s294_s17 = smov [#allocation9]  }
  0x28   :  { %v200_v4 = vpack.c.bf16 %v54_v3, %v53_v2  ;;  %v55_v5 = vld [vmem:[#allocation7 + $0x10] sm:$0xff]  ;;  %v56_v6 = vld [vmem:[#allocation7 + $0x18] sm:$0xff]  ;;  %s167_s18 = sshll.u32 %s294_s17, 4  ;;  %s168_s18 = int_to_ptr.vmem [resolvable:$true] %s167_s18 }
  0x29   :  { %v204_v7 = vpack.c.bf16 %v56_v6, %v55_v5  ;;  %v52_v8 = vld [vmem:[#allocation4] sm:$0xff]  ;;  %v182_v15 = vld [vmem:[%s378_s3] ss:$0 sm:$0xff]  ;;  %s259_s19 = scalar_lea.vmem %s168_s18, 128  ;;  %p264_p3 = scmp.lt.s32.totalorder %s168_s18, %s168_s18 }
  0x2a   :  { %202 = vmatpush3.bf16.xpose.msk.msra.mxu0 %vm201_vm2, %v200_v4  ;;  %p260_p2 = scmp.ne.s32.totalorder %s168_s18, %s259_s19  ;;  %p265_p4 = scmp.lt.s32.totalorder %s259_s19, %s259_s19 }
  0x2b   :  { %203 = vmatprep.subr.bf16.mxu0 %v291_v0 }
  0x2c   :  { %p266_p5 = por %p265_p4, %p264_p3 }
  0x2e   :  { %v51_v9 = vld [vmem:[#allocation2] sm:$0xff]  ;;  %p267_p6 = pnand %p266_p5, %p260_p2 }
  0x32   :  { %206 = vmatpush3.bf16.xpose.msk.msra.mxu0 %vm201_vm2, %v204_v7 }
  0x39   :  { %197 = vmatmul.mubr.msk.f32.vlgmr.msra.gmra.mrb[0].mxu0 %vm49_vm0, %v52_v8 }
 0x10c   :  { %v139_v10 = vpop.f32.mrb[0].mxu0 }
 0x10d   :  { %v143_v11 = vadd.f32 %v139_v10, %v51_v9  ;;  %v198_v12 = vpop.f32.mrb[1].mxu0 }
 0x10f   :  { %144 = vst.msk [vmem:[#allocation2] sm:$0xff] %vm49_vm0, %v143_v11 }
 0x116   :  { %v148_v14 = vld [vmem:[#allocation2] sm:$0xff] }
 0x117   :  { %v151_v16 = vmul.f32 %v150_v13, %v148_v14 }
 0x119   :  { %v159_v17 = vadd.f32 %v182_v15, %v151_v16 }
 0x11b   :  { %160 = vst.msk [vmem:[#allocation9] sm:$0xff] %vm49_vm0, %v159_v17 }
 0x11c   :  { %270 = shalt.err (!%p267_p6)
}
 0x11d   :  { %s271_s21 = scalar_lea.hbm %s379_s4, 128 }
 0x11e   :  { %p272_p7 = scmp.ne.s32.totalorder %s379_s4, %s271_s21  ;;  %p275_p8 = scmp.lt.u32.totalorder %s271_s21, %s379_s4 }
 0x120   :  { %p277_p9 = pnand %p275_p8, %p272_p7 }
 0x122   :  { %280 = shalt.err (!%p277_p9)
}
 0x123   :  { %170 = dma.vmem_to_hbm [thread:$0]  %s168_s18, 128, %s379_s4, [#allocation6]  }
 0x124   :  { %285 = dma.done.wait [#allocation6], 128  }
 0x125   :  { %286 = vsyncadd [#allocation6], 4294967168 }
 0x126   :  { %174 = vsyncpa [#allocation5], 1 }
 0x127   :  { %175 = vsyncpa [#allocation8], 1 }
 0x128   :  { %176 = vsyncpa [#allocation6], 1 }

</bundles_post_ra>
